<compile_context>
chip_gen: v7x
topology: tpu7x:2x2x1
jax: 0.10.0
libtpu: 0.0.40
codegen_flags: <defaults>
</compile_context>

<pallas_src>
import jax
import jax.numpy as jnp
import numpy as np
from jax.experimental import pallas as pl
from jax.experimental.pallas import tpu as pltpu


def fusion_conv_kernel(xp_ref, xi_ref, w1p_ref, w1i_ref, t1_ref,
                       w2_ref, t2_ref, o_ref):
    # NCL layout: channels on sublanes, points on lanes (batch dim squeezed).
    #   xp_ref: (Cp, TN)    xi_ref: (Ci, TN)
    #   w1p_ref: (O, Cp)    w1i_ref: (O, Ci)    w2_ref: (O, O)
    #   t1/t2:   (O, 1)     folded conv-bias + BN shift, broadcast along lanes
    #   o_ref:   (O, TN)
    # BN scale is already folded into w1p/w1i/w2 (exact), so each stage is
    # matmul + shift + ReLU.  The torch.cat is folded into the sum of two
    # small MXU matmuls (no concatenated activation ever hits HBM).
    h = jnp.dot(w1p_ref[...], xp_ref[...], preferred_element_type=jnp.float32)
    h = h + jnp.dot(w1i_ref[...], xi_ref[...],
                    preferred_element_type=jnp.float32)
    h = jnp.maximum(h + t1_ref[...], 0.0)
    h = jnp.dot(w2_ref[...], h, preferred_element_type=jnp.float32)
    h = jnp.maximum(h + t2_ref[...], 0.0)
    o_ref[...] = h.astype(o_ref.dtype)


def _pick_point_tile(n, batch, per_point_bytes, vmem_budget, cap):
    """Pick the point-tile size TN for an N already padded to a 128 multiple.

    Prefers the whole row (contiguous per-batch writeback); otherwise the
    largest 128-multiple divisor of n that fits the VMEM budget.  If the whole
    row fits but batch == 1 (a single parallel grid step would idle v7x's
    second TensorCore), the row is split in two when that stays lane-dense.
    """
    max_tn = max(128, min(cap, vmem_budget // max(per_point_bytes, 1)))
    if n <= max_tn:
        if batch == 1 and n >= 256 and (n // 2) % 128 == 0:
            return n // 2          # >=2 parallel steps for the v7x megacore
        return n                   # one contiguous writeback per batch
    t = (max_tn // 128) * 128
    while t >= 128:
        if n % t == 0:
            return t
        t -= 128
    return 128                     # unreachable when n % 128 == 0


def fusion_conv(point_features, img_features, params, *, tn=None,
                vmem_budget_bytes=12 << 20, tile_cap=32768):
    """point_features: (B, Cp, N), img_features: (B, Ci, N)  ->  (B, O, N)."""
    B, Cp, N = point_features.shape
    Bi, Ci, Ni = img_features.shape
    assert B == Bi and N == Ni
    O = params["w2"].shape[0]
    out_dtype = point_features.dtype
    itemsize = jnp.dtype(out_dtype).itemsize

    # Pad the point axis up to a multiple of 128 so every store is an
    # unmasked, lane-dense vst (padded columns are sliced off at the end).
    n_pad = ((N + 127) // 128) * 128
    if n_pad != N:
        pad = ((0, 0), (0, 0), (0, n_pad - N))
        point_features = jnp.pad(point_features, pad)
        img_features = jnp.pad(img_features, pad)

    # Double-buffered in+out bytes per point (weights are tiny and resident).
    per_point = 2 * (Cp + Ci + O) * itemsize
    if tn is None:
        tn = _pick_point_tile(n_pad, B, per_point, vmem_budget_bytes, tile_cap)
    assert n_pad % tn == 0, "point tile must divide the (padded) point count"

    grid = (B, n_pad // tn)

    def act_spec(c):
        return pl.BlockSpec((pl.Squeezed(), c, tn), lambda b, i: (b, 0, i))

    def full_spec(shape):
        return pl.BlockSpec(shape, lambda b, i: (0, 0))

    # Estimated per-step VMEM; raise the scoped limit only if we outgrow the
    # smallest (v5e, 16 MiB) default.
    est_vmem = (per_point * tn
                + 2 * O * (Cp + Ci + O + 2) * itemsize
                + (1 << 20))
    cp_kwargs = dict(dimension_semantics=("parallel", "parallel"))
    if est_vmem > (14 << 20):
        cp_kwargs["vmem_limit_bytes"] = int(est_vmem)

    out = pl.pallas_call(
        fusion_conv_kernel,
        out_shape=jax.ShapeDtypeStruct((B, O, n_pad), out_dtype),
        grid_spec=pltpu.PrefetchScalarGridSpec(
            num_scalar_prefetch=0,
            grid=grid,
            in_specs=[
                act_spec(Cp),                 # point features (B, Cp, Npad)
                act_spec(Ci),                 # img features   (B, Ci, Npad)
                full_spec((O, Cp)),           # scale-folded conv1 rows (point)
                full_spec((O, Ci)),           # scale-folded conv1 rows (img)
                full_spec((O, 1)),            # t1 (bias+BN shift)
                full_spec((O, O)),            # scale-folded conv2 weight
                full_spec((O, 1)),            # t2 (bias+BN shift)
            ],
            out_specs=pl.BlockSpec((pl.Squeezed(), O, tn),
                                   lambda b, i: (b, 0, i)),
        ),
        compiler_params=pltpu.CompilerParams(**cp_kwargs),
    )(point_features, img_features,
      params["w1p"], params["w1i"], params["t1"],
      params["w2"], params["t2"])

    if n_pad != N:
        out = out[:, :, :N]
    return out


def make_params(key, c_point, c_img, outplanes, dtype=jnp.float32, eps=1e-5):
    """Deterministic synthetic Conv1d weights/biases + BN running stats with
    eval-mode BatchNorm fully folded:
      * BN scale folded into the conv weights (exact: s*(Wx) == (s*W)x),
      * conv bias + BN mean/shift folded into a per-channel shift t.
    conv1's weight is pre-split along Cin into (point, img) row blocks so the
    kernel never needs the concatenated activation."""
    inplanes = c_point + c_img
    ks = jax.random.split(key, 10)

    def uniform(k, shape, bound):
        return jax.random.uniform(k, shape, dtype, -bound, bound)

    # conv1: Conv1d(inplanes, outplanes, 1) -> weight (O, Cin), bias (O,)
    b1 = 1.0 / np.sqrt(inplanes)
    w1 = uniform(ks[0], (outplanes, inplanes), b1)
    c1_bias = uniform(ks[1], (outplanes,), b1)
    # conv2: Conv1d(outplanes, outplanes, 1)
    b2 = 1.0 / np.sqrt(outplanes)
    w2 = uniform(ks[2], (outplanes, outplanes), b2)
    c2_bias = uniform(ks[3], (outplanes,), b2)

    # BatchNorm1d params + running stats (nontrivial, deterministic)
    g1 = 1.0 + 0.1 * jax.random.normal(ks[4], (outplanes,), dtype)
    be1 = 0.1 * jax.random.normal(ks[5], (outplanes,), dtype)
    m1 = 0.05 * jax.random.normal(ks[6], (outplanes,), dtype)
    v1 = 1.0 + 0.1 * jnp.abs(jax.random.normal(ks[7], (outplanes,), dtype))
    g2 = 1.0 + 0.1 * jax.random.normal(ks[8], (outplanes,), dtype)
    be2 = 0.1 * jax.random.normal(ks[9], (outplanes,), dtype)
    m2 = jnp.zeros((outplanes,), dtype)
    v2 = jnp.ones((outplanes,), dtype)

    # Fold conv bias + BN(running stats): scale into W, shift into t.
    s1 = g1 / jnp.sqrt(v1 + eps)
    t1 = be1 + (c1_bias - m1) * s1
    s2 = g2 / jnp.sqrt(v2 + eps)
    t2 = be2 + (c2_bias - m2) * s2
    w1s = w1 * s1[:, None]
    w2s = w2 * s2[:, None]

    return {
        "w1p": w1s[:, :c_point],     # (O, Cp) — conv1 rows hitting point feats
        "w1i": w1s[:, c_point:],     # (O, Ci) — conv1 rows hitting img feats
        "w2": w2s,                   # (O, O)
        "t1": t1[:, None],           # (O, 1)
        "t2": t2[:, None],           # (O, 1)
    }


def fusion_conv_ref(point_features, img_features, params):
    """Pure-JAX reference of the same fused forward (NCL throughout)."""
    w1 = jnp.concatenate([params["w1p"], params["w1i"]], axis=1)   # (O, Cin)
    x = jnp.concatenate([point_features, img_features], axis=1)    # (B, Cin, N)
    h = jnp.einsum("oc,bcn->bon", w1, x) + params["t1"][None]
    h = jnp.maximum(h, 0.0)
    h = jnp.einsum("oc,bcn->bon", params["w2"], h) + params["t2"][None]
    h = jnp.maximum(h, 0.0)
    return h


def _check_case(key, b, c_point, c_img, n, outplanes):
    k_pt, k_img, k_par = jax.random.split(key, 3)
    pt = jax.random.normal(k_pt, (b, c_point, n), jnp.float32)
    im = jax.random.normal(k_img, (b, c_img, n), jnp.float32)
    params = make_params(k_par, c_point, c_img, outplanes)

    out = jax.block_until_ready(fusion_conv(pt, im, params))
    assert out.shape == (b, outplanes, n), out.shape
    ref = jax.block_until_ready(fusion_conv_ref(pt, im, params))
    np.testing.assert_allclose(np.asarray(out), np.asarray(ref),
                               rtol=1e-3, atol=1e-3)


if __name__ == "__main__":
    key = jax.random.PRNGKey(0)
    k0, k1, k2 = jax.random.split(key, 3)

    # Primary small case (matches the module's typical shapes).
    _check_case(k0, b=2, c_point=4, c_img=4, n=256, outplanes=32)
    # B == 1: whole row would be one grid step -> tile split for the megacore.
    _check_case(k1, b=1, c_point=4, c_img=4, n=512, outplanes=32)
    # N not a multiple of 128: exercises the host-side lane padding path.
    _check_case(k2, b=2, c_point=4, c_img=4, n=200, outplanes=32)

    print("KERNEL_OK")
</pallas_src>

<mosaic_0001>
module attributes {stable_mosaic.version = 11 : i64} {
  func.func @fusion_conv_kernel(%arg0: i32, %arg1: i32, %arg2: memref<1x4x256xf32, #tpu.memory_space<vmem>>, %arg3: memref<1x4x256xf32, #tpu.memory_space<vmem>>, %arg4: memref<32x4xf32, #tpu.memory_space<vmem>>, %arg5: memref<32x4xf32, #tpu.memory_space<vmem>>, %arg6: memref<32x1xf32, #tpu.memory_space<vmem>>, %arg7: memref<32x32xf32, #tpu.memory_space<vmem>>, %arg8: memref<32x1xf32, #tpu.memory_space<vmem>>, %arg9: memref<1x32x256xf32, #tpu.memory_space<vmem>>) attributes {dimension_semantics = [#tpu.dimension_semantics<parallel>, #tpu.dimension_semantics<parallel>], iteration_bounds = array<i64: 2, 1>, scalar_prefetch = 0 : i64, scratch_operands = 0 : i64, tpu.core_type = #tpu.core_type<tc>, window_params = [{transform_indices = @transform_0, window_bounds = array<i64: 1, 4, 256>}, {transform_indices = @transform_1, window_bounds = array<i64: 1, 4, 256>}, {pipeline_mode = #tpu.pipeline_mode<synchronous>, transform_indices = @transform_2, window_bounds = array<i64: 32, 4>}, {pipeline_mode = #tpu.pipeline_mode<synchronous>, transform_indices = @transform_3, window_bounds = array<i64: 32, 4>}, {pipeline_mode = #tpu.pipeline_mode<synchronous>, transform_indices = @transform_4, window_bounds = array<i64: 32, 1>}, {pipeline_mode = #tpu.pipeline_mode<synchronous>, transform_indices = @transform_5, window_bounds = array<i64: 32, 32>}, {pipeline_mode = #tpu.pipeline_mode<synchronous>, transform_indices = @transform_6, window_bounds = array<i64: 32, 1>}, {transform_indices = @transform_7, window_bounds = array<i64: 1, 32, 256>}]} {
    %c0 = arith.constant 0 : index
    %c0_0 = arith.constant 0 : index
    %0 = vector.load %arg4[%c0, %c0_0] : memref<32x4xf32, #tpu.memory_space<vmem>>, vector<32x4xf32>
    %c0_1 = arith.constant 0 : index
    %c0_2 = arith.constant 0 : index
    %c0_3 = arith.constant 0 : index
    %1 = vector.load %arg2[%c0_1, %c0_2, %c0_3] : memref<1x4x256xf32, #tpu.memory_space<vmem>>, vector<1x4x256xf32>
    %2 = vector.shape_cast %1 : vector<1x4x256xf32> to vector<4x256xf32>
    %cst = arith.constant dense<0.000000e+00> : vector<32x256xf32>
    %3 = tpu.matmul %0, %2, %cst {dimension_numbers = #tpu.dot_dimension_numbers<[1], [0], [0], [1], [0, 0, 1, 1], [], []>} : vector<32x4xf32>, vector<4x256xf32>, vector<32x256xf32> -> vector<32x256xf32>
    %c0_4 = arith.constant 0 : index
    %c0_5 = arith.constant 0 : index
    %4 = vector.load %arg5[%c0_4, %c0_5] : memref<32x4xf32, #tpu.memory_space<vmem>>, vector<32x4xf32>
    %c0_6 = arith.constant 0 : index
    %c0_7 = arith.constant 0 : index
    %c0_8 = arith.constant 0 : index
    %5 = vector.load %arg3[%c0_6, %c0_7, %c0_8] : memref<1x4x256xf32, #tpu.memory_space<vmem>>, vector<1x4x256xf32>
    %6 = vector.shape_cast %5 : vector<1x4x256xf32> to vector<4x256xf32>
    %cst_9 = arith.constant dense<0.000000e+00> : vector<32x256xf32>
    %7 = tpu.matmul %4, %6, %cst_9 {dimension_numbers = #tpu.dot_dimension_numbers<[1], [0], [0], [1], [0, 0, 1, 1], [], []>} : vector<32x4xf32>, vector<4x256xf32>, vector<32x256xf32> -> vector<32x256xf32>
    %8 = arith.addf %3, %7 : vector<32x256xf32>
    %c0_10 = arith.constant 0 : index
    %c0_11 = arith.constant 0 : index
    %9 = vector.load %arg6[%c0_10, %c0_11] : memref<32x1xf32, #tpu.memory_space<vmem>>, vector<32x1xf32>
    %10 = vector.broadcast %9 : vector<32x1xf32> to vector<32x256xf32>
    %11 = arith.addf %8, %10 : vector<32x256xf32>
    %cst_12 = arith.constant 0.000000e+00 : f32
    %12 = vector.broadcast %cst_12 : f32 to vector<32x256xf32>
    %13 = arith.maximumf %11, %12 : vector<32x256xf32>
    %c0_13 = arith.constant 0 : index
    %c0_14 = arith.constant 0 : index
    %14 = vector.load %arg7[%c0_13, %c0_14] : memref<32x32xf32, #tpu.memory_space<vmem>>, vector<32x32xf32>
    %cst_15 = arith.constant dense<0.000000e+00> : vector<32x256xf32>
    %15 = tpu.matmul %14, %13, %cst_15 {dimension_numbers = #tpu.dot_dimension_numbers<[1], [0], [0], [1], [0, 0, 1, 1], [], []>} : vector<32x32xf32>, vector<32x256xf32>, vector<32x256xf32> -> vector<32x256xf32>
    %c0_16 = arith.constant 0 : index
    %c0_17 = arith.constant 0 : index
    %16 = vector.load %arg8[%c0_16, %c0_17] : memref<32x1xf32, #tpu.memory_space<vmem>>, vector<32x1xf32>
    %17 = vector.broadcast %16 : vector<32x1xf32> to vector<32x256xf32>
    %18 = arith.addf %15, %17 : vector<32x256xf32>
    %cst_18 = arith.constant 0.000000e+00 : f32
    %19 = vector.broadcast %cst_18 : f32 to vector<32x256xf32>
    %20 = arith.maximumf %18, %19 : vector<32x256xf32>
    %c0_19 = arith.constant 0 : index
    %c0_20 = arith.constant 0 : index
    %c0_21 = arith.constant 0 : index
    %21 = vector.load %arg9[%c0_19, %c0_20, %c0_21] : memref<1x32x256xf32, #tpu.memory_space<vmem>>, vector<1x32x256xf32>
    %22 = vector.shape_cast %21 : vector<1x32x256xf32> to vector<32x256xf32>
    %23 = vector.shape_cast %20 : vector<32x256xf32> to vector<1x32x256xf32>
    tpu.vector_store %arg9[%c0_19, %c0_20, %c0_21], %23 {strides = array<i32>} : memref<1x32x256xf32, #tpu.memory_space<vmem>>, vector<1x32x256xf32>,
    return
  }
  func.func @transform_0(%arg0: i32, %arg1: i32) -> (i32, i32, i32) {
    %c0_i32 = arith.constant 0 : i32
    %c0_i32_0 = arith.constant 0 : i32
    return %arg0, %c0_i32, %arg1 : i32, i32, i32
  }
  func.func @transform_1(%arg0: i32, %arg1: i32) -> (i32, i32, i32) {
    %c0_i32 = arith.constant 0 : i32
    %c0_i32_0 = arith.constant 0 : i32
    return %arg0, %c0_i32, %arg1 : i32, i32, i32
  }
  func.func @transform_2(%arg0: i32, %arg1: i32) -> (i32, i32) {
    %c0_i32 = arith.constant 0 : i32
    %c0_i32_0 = arith.constant 0 : i32
    %c0_i32_1 = arith.constant 0 : i32
    return %c0_i32, %c0_i32_0 : i32, i32
  }
  func.func @transform_3(%arg0: i32, %arg1: i32) -> (i32, i32) {
    %c0_i32 = arith.constant 0 : i32
    %c0_i32_0 = arith.constant 0 : i32
    %c0_i32_1 = arith.constant 0 : i32
    return %c0_i32, %c0_i32_0 : i32, i32
  }
  func.func @transform_4(%arg0: i32, %arg1: i32) -> (i32, i32) {
    %c0_i32 = arith.constant 0 : i32
    %c0_i32_0 = arith.constant 0 : i32
    %c0_i32_1 = arith.constant 0 : i32
    return %c0_i32, %c0_i32_0 : i32, i32
  }
  func.func @transform_5(%arg0: i32, %arg1: i32) -> (i32, i32) {
    %c0_i32 = arith.constant 0 : i32
    %c0_i32_0 = arith.constant 0 : i32
    %c0_i32_1 = arith.constant 0 : i32
    return %c0_i32, %c0_i32_0 : i32, i32
  }
  func.func @transform_6(%arg0: i32, %arg1: i32) -> (i32, i32) {
    %c0_i32 = arith.constant 0 : i32
    %c0_i32_0 = arith.constant 0 : i32
    %c0_i32_1 = arith.constant 0 : i32
    return %c0_i32, %c0_i32_0 : i32, i32
  }
  func.func @transform_7(%arg0: i32, %arg1: i32) -> (i32, i32, i32) {
    %c0_i32 = arith.constant 0 : i32
    %c0_i32_0 = arith.constant 0 : i32
    return %arg0, %c0_i32, %arg1 : i32, i32, i32
  }
}

</mosaic_0001>

<bundles_post_ra>
// kernel: tpu_custom_call.1
= control target key start
LH: loop header
LB: loop body
LE: loop exit
PB: predicated region body
PF: predicated region fallthrough
CT: control target
= control target key end

     0   :  { %12 = vsyncpa [#allocation3], 0  ;;  %s1328_s0 = inlined_call_operand.vmem [shape: f32[2,4,256], index: 0, kind: input, shape index: {}]   ;;  %s1329_s1 = inlined_call_operand.vmem [shape: f32[2,4,256], index: 1, kind: input, shape index: {}]   ;;  %s1330_s2 = inlined_call_operand.vmem [shape: f32[32,4], index: 2, kind: input, shape index: {}]   ;;  %s1331_s3 = inlined_call_operand.vmem [shape: f32[32,4], index: 3, kind: input, shape index: {}]   ;;  %s1332_s4 = inlined_call_operand.vmem [shape: f32[32,1], index: 4, kind: input, shape index: {}]   ;;  %s1333_s5 = inlined_call_operand.vmem [shape: f32[32,32], index: 5, kind: input, shape index: {}]   ;;  %s1334_s6 = inlined_call_operand.vmem [shape: f32[32,1], index: 6, kind: input, shape index: {}]   ;;  %s1335_s7 = inlined_call_operand.hbm [shape: f32[2,32,256], index: 7, kind: output, shape index: {}]  }
   0x1   :  { %14 = vsyncpa [#allocation3 + $0x1], 0  ;;  %s1109_s24 = smov 0   ;;  %s1111_s25 = smov 0  }
   0x2   :  { %s1113_s26 = smov 0   ;;  %s1115_s27 = smov 0  }
   0x3   :  { %s1117_s28 = smov 0   ;;  %s1119_s29 = smov 0  }
   0x4 LB: > { %s869_s30 = sadd.s32 4294967295, %s1062_s29   ;;  %s870_s8 = sadd.s32 4294967294, %s1062_s29   ;;  %s1062_s29 = sphi %s1119_s29, %s20_s29   ;;  %s1058_s28 = sphi %s1117_s28, %s1345_s28   ;;  %s1054_s27 = sphi %s1115_s27, %s1344_s27   ;;  %s1050_s26 = sphi %s1113_s26, %s1343_s26   ;;  %s1046_s25 = sphi %s1111_s25, %s1342_s25   ;;  %s1042_s24 = sphi %s1109_s24, %s1341_s24  }
   0x5   : > { %s32_s9 = sadd.s32 1, %s1058_s28  ;;  %s202_s10 = sadd.s32 1, %s1050_s26 }
   0x6   : > { %p34_p0 = scmp.ge.s32.totalorder %s32_s9, 2  ;;  %p212_p1 = scmp.ne.s32.totalorder %s1050_s26, %s1046_s25 }
   0x7   : > { %p213_p2 = scmp.eq.s32.totalorder %s869_s30, 1  ;;  %p218_p3 = scmp.ne.s32.totalorder %s1046_s25, %s1042_s24 }
   0x8   : > { %s1347_s9 = smov (%p34_p0, %s32_s9), 0  ;;  %p219_p5 = scmp.eq.s32.totalorder %s870_s8, 1 }
   0x9   : > { %1337 = sst [smem:[#allocation5_spill]] %s1347_s9  ;;  %p1149_p4 = por %p213_p2, %p212_p1 }
   0xa   : > { %s197_s12 = ssub.s32 %s1058_s28, %s1347_s9  ;;  %p873_p6 = scmp.ge.s32.totalorder %s1062_s29, 1 }
   0xb   : > { %p200_p7 = scmp.eq.s32.totalorder %s197_s12, 0  ;;  %p1156_p8 = por %p219_p5, %p218_p3 }
   0xc   : > { %p278_p9 = scmp.lt.s32.totalorder %s1062_s29, 3 }
   0xd   : > { %s1162_s14 = scalar_select %p200_p7, %s1050_s26, %s202_s10  }
   0xe   : > { %p279_p10 = pnand %p873_p6, %p278_p9 }
   0xf   : > { %p324_p11 = scmp.lt.s32.totalorder (!%p279_p10), %s1054_s27, 1  ;;  %v1064_v0 = vmov (!%p279_p10), 0.0   ;;  %v1065_v1 = vmov (!%p279_p10), 0   ;;  %v570_v2 = vld [vmem:[%s1332_s4] sm:$0xff] (!%p279_p10)  ;;  %v572_v3 = vld [vmem:[%s1332_s4 + $0x10] sm:$0xff] (!%p279_p10)  ;;  %v571_v4 = vld [vmem:[%s1332_s4 + $0x8] sm:$0xff] (!%p279_p10) }
  0x10   : > { %282 = sbr.rel (%p279_p10) target bundleno = 522 (0x20a), region = 48  ;;  %438 = vmatprep.mubr.f32.mxu0 (!%p279_p10), %v1064_v0  ;;  %450 = vmatprep.mubr.f32.mxu1 (!%p279_p10), %v1064_v0  ;;  %v573_v5 = vld [vmem:[%s1332_s4 + $0x18] sm:$0xff] (!%p279_p10)  ;;  %vm369_vm0 = vcmask (!%p279_p10), 1043456   ;;  %v349_v10 = vld [vmem:[%s1331_s3] sm:$0xff] (!%p279_p10)  ;;  %vm356_vm1 = vcmask (!%p279_p10), 31744   ;;  %v351_v11 = vld [vmem:[%s1331_s3 + $0x10] sm:$0xff] (!%p279_p10) }
  0x11   : > { %980 = vset.pattern.permute.xlu0 (!%p279_p10), %v1065_v1  ;;  %981 = vset.pattern.permute.xlu1 (!%p279_p10), %v1065_v1  ;;  %v614_v12 = vld [vmem:[%s1334_s6] sm:$0xff] (!%p279_p10)  ;;  %v615_v13 = vld [vmem:[%s1334_s6 + $0x8] sm:$0xff] (!%p279_p10)  ;;  %v352_v15 = vld [vmem:[%s1331_s3 + $0x18] sm:$0xff] (!%p279_p10)  ;;  %vm638_vm2 = vcmask (!%p279_p10), 261120   ;;  %s1066_s17 = smov (!%p279_p10), [#allocation2]  }
  0x12   : > { %576 = vperm.xlu0 (!%p279_p10), %980, %v570_v2   ;;  %586 = vperm.xlu1 (!%p279_p10), %981, %v572_v3   ;;  %v350_v14 = vld [vmem:[%s1331_s3 + $0x8] sm:$0xff] (!%p279_p10)  ;;  %v616_v16 = vld [vmem:[%s1334_s6 + $0x10] sm:$0xff] (!%p279_p10)  ;;  %v617_v17 = vld [vmem:[%s1334_s6 + $0x18] sm:$0xff] (!%p279_p10) }
  0x13   : > { %v344_v18 = vld [vmem:[%s1330_s2] sm:$0xff] (!%p279_p10)  ;;  %v345_v19 = vld [vmem:[%s1330_s2 + $0x8] sm:$0xff] (!%p279_p10)  ;;  %v346_v20 = vld [vmem:[%s1330_s2 + $0x10] sm:$0xff] (!%p279_p10) }
  0x14   : > { %v347_v21 = vld [vmem:[%s1330_s2 + $0x18] sm:$0xff] (!%p279_p10)  ;;  %v610_v62 = vld [vmem:[%s1333_s5] sm:$0xff] (!%p279_p10)  ;;  %v611_v63 = vld [vmem:[%s1333_s5 + $0x8] sm:$0xff] (!%p279_p10) }
  0x15   : > { %v612_v1 = vld [vmem:[%s1333_s5 + $0x10] sm:$0xff] (!%p279_p10)  ;;  %v613_v2 = vld [vmem:[%s1333_s5 + $0x18] sm:$0xff] (!%p279_p10) }
  0x16   : > { %581 = vperm.xlu0 (!%p279_p10), %980, %v571_v4   ;;  %591 = vperm.xlu1 (!%p279_p10), %981, %v573_v5  }
  0x17   : > { %s325_s15 = scalar_select %p324_p11, %s1054_s27, 1 }
  0x19   : > { %s900_s20 = sshll.u32 %s325_s15, 3  ;;  %s988_s15 = sshll.u32 %s1066_s17, 4  ;;  %s989_s15 = int_to_ptr.vmem [resolvable:$false] %s988_s15 }
  0x1a   : > { %s331_s23 = scalar_lea.vmem %s1328_s0, %s900_s20  ;;  %s341_s10 = scalar_lea.vmem %s1329_s1, %s900_s20  ;;  %620 = vperm.xlu0 %980, %v614_v12   ;;  %625 = vperm.xlu1 %981, %v615_v13  }
  0x1b   : > { %v348_v6 = vld [vmem:[%s331_s23] sm:$0xff]  ;;  %s320_s20 = sand.u32 1, %s1046_s25   ;;  %s902_s23 = sshll.u32 %s1054_s27, 10 }
  0x1c   : > { %v353_v7 = vld [vmem:[%s341_s10] sm:$0xff]  ;;  %v464_v9 = vcombine.high %v348_v6, %v348_v6  ;;  %s874_s21 = sshll.u32 %s320_s20, 6  ;;  %s1274_s12 = scalar_lea.hbm %s1335_s7, %s902_s23 }
  0x1d   : > { %v355_v8 = vcombine.high %v353_v7, %v353_v7  ;;  %s1261_s22 = scalar_lea.vmem [#allocation2], %s874_s21  ;;  %s1282_s27 = scalar_lea.sflag [#allocation3], %s320_s20 }
  0x1e   : > { %630 = vperm.xlu0 %980, %v616_v16   ;;  %635 = vperm.xlu1 %981, %v617_v17   ;;  %s772_s30 = sshll.u32 %s1261_s22, 4  ;;  %s990_s18 = scalar_lea.vmem %s989_s15, 2048  ;;  %s1276_s30 = int_to_ptr.vmem [resolvable:$true] %s772_s30 }
  0x1f   : > { %879 = vmatprep.subr.msk.mxu0 %vm369_vm0, %v355_v8  ;;  %911 = vmatprep.subr.msk.mxu1 %vm369_vm0, %v355_v8  ;;  %s984_s16 = scalar_lea.vmem %s1276_s30, 1024  ;;  %p991_p1 = scmp.lt.s32.totalorder %s1276_s30, %s989_s15 }
  0x20   : > { %880 = vmatpush1.msk.msra.mxu0 %vm369_vm0, %v353_v7  ;;  %912 = vmatpush1.msk.msra.mxu1 %vm369_vm0, %v353_v7  ;;  %p985_p12 = scmp.ne.s32.totalorder %s1276_s30, %s984_s16  ;;  %p992_p2 = scmp.lt.s32.totalorder %s990_s18, %s984_s16 }
  0x21   : > { %881 = vmatmul.mubr.msk.f32.vlgmr.msra.gmra.mrb[0].mxu0 %vm356_vm1, %v349_v10  ;;  %885 = vmatprep.subr.msk.mxu0 %vm369_vm0, %v464_v9 }
  0x22   : > { %886 = vmatpush1.msk.msra.mxu0 %vm369_vm0, %v348_v6  ;;  %444 = vmatprep.mubr.f32.mxu0 %v1064_v0  ;;  %p986_p13 = pnand %p985_p12, %p1149_p4  ;;  %p993_p3 = por %p992_p2, %p991_p1 }
  0x23   : > { %883 = vmatmul.mubr.msk.f32.vlgmr.msra.gmra.mrb[0].mxu1 %vm356_vm1, %v351_v11 }
  0x24   : > { %456 = vmatprep.mubr.f32.mxu1 %v1064_v0  ;;  %p987_p0 = pneg %p986_p13 }
  0x25   : > { %882 = vmatmul.mubr.msk.f32.gmra.mrb[2].mxu0 %vm356_vm1, %v350_v14 }
  0x26   : > { %545 = vmatprep.mubr.f32.mxu0 %v1064_v0  ;;  %p994_p5 = pnand %p993_p3, %p987_p0 }
  0x27   : > { %884 = vmatmul.mubr.msk.f32.gmra.mrb[2].mxu1 %vm356_vm1, %v352_v15 }
  0x28   : > { %715 = vmatprep.mubr.f32.mxu1 %v1064_v0 }
  0x29   : > { %887 = vmatmul.mubr.msk.f32.vlgmr.msra.gmra.mrb[0].mxu0 %vm356_vm1, %v344_v18 }
  0x2a   : > { %551 = vmatprep.mubr.f32.mxu0 %v1064_v0 }
  0x2d   : > { %888 = vmatmul.mubr.msk.f32.gmra.mrb[2].mxu0 %vm356_vm1, %v345_v19 }
  0x2e   : > { %557 = vmatprep.mubr.f32.mxu0 %v1064_v0 }
  0x31   : > { %889 = vmatmul.mubr.msk.f32.gmra.mrb[4].mxu0 %vm356_vm1, %v346_v20 }
  0x32   : > { %563 = vmatprep.mubr.f32.mxu0 %v1064_v0 }
  0x35   : > { %890 = vmatmul.mubr.msk.f32.gmra.mrb[6].mxu0 %vm356_vm1, %v347_v21 }
  0x91   : > { %v577_v24 = vpop.permute.xlu0 %576  ;;  %v587_v38 = vpop.permute.xlu1 %586 }
  0x95   : > { %v582_v30 = vpop.permute.xlu0 %581  ;;  %v592_v51 = vpop.permute.xlu1 %591 }
  0x99   : > { %v621_v3 = vpop.permute.xlu0 %620  ;;  %v626_v9 = vpop.permute.xlu1 %625 }
  0x9d   : > { %v631_v15 = vpop.permute.xlu0 %630 }
  0xf6   : > { %v452_v22 = vpop.f32.mrb[0].mxu1 }
  0xf7   : > { %v454_v23 = vpop.f32.mrb[1].mxu1 }
  0xfa   : > { %v458_v25 = vpop.f32.mrb[2].mxu1 }
  0xfb   : > { %v460_v26 = vpop.f32.mrb[3].mxu1 }
  0xfc   : > { %v547_v27 = vpop.f32.mrb[0].mxu0 }
  0xfd   : > { %v549_v28 = vpop.f32.mrb[1].mxu0  ;;  %v594_v29 = vadd.f32 %v577_v24, %v547_v27 }
  0xfe   : > { %v595_v31 = vadd.f32 %v577_v24, %v549_v28 }
  0xff   : > { %v602_v36 = vmax.f32 %v594_v29, 0.0 }
 0x100   : > { %v553_v32 = vpop.f32.mrb[2].mxu0  ;;  %v603_v39 = vmax.f32 %v595_v31, 0.0 }
 0x101   : > { %v596_v33 = vadd.f32 %v582_v30, %v553_v32  ;;  %v555_v34 = vpop.f32.mrb[3].mxu0 }
 0x102   : > { %v597_v35 = vadd.f32 %v582_v30, %v555_v34 }
 0x103   : > { %v604_v37 = vmax.f32 %v596_v33, 0.0 }
 0x104   : > { %v605_v40 = vmax.f32 %v597_v35, 0.0  ;;  %v559_v41 = vpop.f32.mrb[4].mxu0 }
 0x105   : > { %v905_v42 = vpack.c.bf16 %v604_v37, %v602_v36  ;;  %v560_v43 = vadd.f32 %v559_v41, %v452_v22  ;;  %v561_v44 = vpop.f32.mrb[5].mxu0  ;;  %v636_v22 = vpop.permute.xlu1 %635 }
 0x106   : > { %v903_v45 = vpack.c.bf16 %v605_v40, %v603_v39  ;;  %v562_v46 = vadd.f32 %v561_v44, %v454_v23 }
 0x107   : > { %v598_v48 = vadd.f32 %v587_v38, %v560_v43 }
 0x108   : > { %v565_v47 = vpop.f32.mrb[6].mxu0  ;;  %904 = vmatprep.subr.bf16.mxu1 %v903_v45  ;;  %v599_v52 = vadd.f32 %v587_v38, %v562_v46 }
 0x109   : > { %v566_v49 = vadd.f32 %v565_v47, %v458_v25  ;;  %v567_v50 = vpop.f32.mrb[7].mxu0  ;;  %906 = vmatpush1.bf16.msra.mxu1 %v905_v42  ;;  %v606_v56 = vmax.f32 %v598_v48, 0.0 }
 0x10a   : > { %v568_v53 = vadd.f32 %v567_v50, %v460_v26  ;;  %v607_v58 = vmax.f32 %v599_v52, 0.0 }
 0x10b   : > { %v600_v54 = vadd.f32 %v592_v51, %v566_v49 }
 0x10c   : > { %v601_v55 = vadd.f32 %v592_v51, %v568_v53 }
 0x10d   : > { %v608_v57 = vmax.f32 %v600_v54, 0.0 }
 0x10e   : > { %v609_v59 = vmax.f32 %v601_v55, 0.0 }
 0x10f   : > { %v909_v60 = vpack.c.bf16 %v608_v57, %v606_v56 }
 0x110   : > { %v907_v61 = vpack.c.bf16 %v609_v59, %v607_v58 }
 0x112   : > { %908 = vmatprep.subr.bf16.mxu1 %v907_v61 }
 0x113   : > { %910 = vmatpush1.bf16.msra.mxu1 %v909_v60 }
 0x116   : > { %891 = vmatmul.mubr.msk.f32.vlgmr.msra.gmra.mrb[4].mxu1 %vm638_vm2, %v610_v62 }
 0x117   : > { %721 = vmatprep.mubr.f32.mxu1 %v1064_v0 }
 0x11a   : > { %892 = vmatmul.mubr.msk.f32.gmra.mrb[6].mxu1 %vm638_vm2, %v611_v63 }
 0x11b   : > { %727 = vmatprep.mubr.f32.mxu1 %v1064_v0 }
 0x11e   : > { %893 = vmatmul.mubr.msk.f32.gmra.mrb[8].mxu1 %vm638_vm2, %v612_v1 }
 0x11f   : > { %733 = vmatprep.mubr.f32.mxu1 %v1064_v0 }
 0x122   : > { %894 = vmatmul.mubr.msk.f32.gmra.mrb[10].mxu1 %vm638_vm2, %v613_v2 }
 0x1e9   : > { %v717_v4 = vpop.f32.mrb[4].mxu1 }
 0x1ea   : > { %v718_v5 = vadd.f32 %v717_v4, %v621_v3  ;;  %v719_v6 = vpop.f32.mrb[5].mxu1 }
 0x1eb   : > { %v720_v7 = vadd.f32 %v719_v6, %v621_v3 }
 0x1ec   : > { %v740_v8 = vmax.f32 %v718_v5, 0.0 }
 0x1ed   : > { %v741_v10 = vmax.f32 %v720_v7, 0.0  ;;  %v723_v11 = vpop.f32.mrb[6].mxu1 }
 0x1ee   : > { %748 = vst [vmem:[%s1261_s22] sm:$0xff] %v740_v8  ;;  %v724_v0 = vadd.f32 %v723_v11, %v626_v9  ;;  %v725_v12 = vpop.f32.mrb[7].mxu1 }
 0x1ef   : > { %749 = vst [vmem:[%s1261_s22 + $0x8] sm:$0xff] %v741_v10  ;;  %v726_v13 = vadd.f32 %v725_v12, %v626_v9 }
 0x1f0   : > { %v742_v14 = vmax.f32 %v724_v0, 0.0 }
 0x1f1   : > { %v743_v16 = vmax.f32 %v726_v13, 0.0  ;;  %v729_v17 = vpop.f32.mrb[8].mxu1 }
 0x1f2   : > { %750 = vst [vmem:[%s1261_s22 + $0x10] sm:$0xff] %v742_v14  ;;  %v730_v18 = vadd.f32 %v729_v17, %v631_v15  ;;  %v731_v19 = vpop.f32.mrb[9].mxu1 }
 0x1f3   : > { %751 = vst [vmem:[%s1261_s22 + $0x18] sm:$0xff] %v743_v16  ;;  %v732_v20 = vadd.f32 %v731_v19, %v631_v15 }
 0x1f4   : > { %v744_v21 = vmax.f32 %v730_v18, 0.0 }
 0x1f5   : > { %v745_v23 = vmax.f32 %v732_v20, 0.0  ;;  %v735_v24 = vpop.f32.mrb[10].mxu1 }
 0x1f6   : > { %752 = vst [vmem:[%s1261_s22 + $0x20] sm:$0xff] %v744_v21  ;;  %v736_v25 = vadd.f32 %v735_v24, %v636_v22  ;;  %v737_v26 = vpop.f32.mrb[11].mxu1 }
 0x1f7   : > { %753 = vst [vmem:[%s1261_s22 + $0x28] sm:$0xff] %v745_v23  ;;  %v738_v27 = vadd.f32 %v737_v26, %v636_v22 }
 0x1f8   : > { %v746_v28 = vmax.f32 %v736_v25, 0.0 }
 0x1f9   : > { %v747_v29 = vmax.f32 %v738_v27, 0.0 }
 0x1fa   : > { %754 = vst [vmem:[%s1261_s22 + $0x30] sm:$0xff] %v746_v28 }
 0x1fb   : > { %755 = vst [vmem:[%s1261_s22 + $0x38] sm:$0xff] %v747_v29 }
 0x1fc   : > { %997 = shalt.err (!%p994_p5)
}
 0x1fd   : > { %s998_s9 = scalar_lea.hbm %s1274_s12, 1024  ;;  %s1002_s21 = scalar_lea.hbm %s1335_s7, 2048 }
 0x1fe   : > { %p999_p6 = scmp.ne.s32.totalorder %s1274_s12, %s998_s9  ;;  %p1003_p10 = scmp.lt.u32.totalorder %s1274_s12, %s1335_s7 }
 0x1ff   : > { %p1004_p11 = scmp.lt.u32.totalorder %s1002_s21, %s998_s9  ;;  %p1006_p13 = scmp.lt.u32.totalorder %s998_s9, %s1274_s12 }
 0x200   : > { %p1000_p7 = pnand %p999_p6, %p1149_p4 }
 0x201   : > { %p1005_p12 = por %p1004_p11, %p1003_p10 }
 0x202   : > { %p1001_p9 = pneg %p1000_p7 }
 0x203   : > { %p1007_p0 = por %p1006_p13, %p1005_p12 }
 0x205   : > { %p1008_p1 = pnand %p1007_p0, %p1001_p9 }
 0x207   : > { %1011 = shalt.err (!%p1008_p1)
}
 0x208   : > { %s1067_s8 = smov 256   ;;  %s1068_s10 = smov 16  }
 0x209   : > { %921 = dma.vmem_to_hbm [thread:$0]  (%p1149_p4), %s1276_s30, 1024, %s1274_s12, %s1282_s27, %s1067_s8, %s1067_s8, %s1068_s10  }
 0x20a PF: > { %p927_p2 = scmp.ge.s32.totalorder %s1062_s29, 2  ;;  %s787_s16 = sand.u32 1, %s1042_s24  }
 0x20b   : > { %s788_s17 = scalar_lea.sflag [#allocation3], %s787_s16 }
 0x20c   : > { %p924_p3 = pnand %p927_p2, %p1156_p8 }
 0x20e   : > { %1037 = dma.done.wait (!%p924_p3), %s788_s17, 1024  }
 0x20f   : > { %1039 = vsyncadd (!%p924_p3), %s788_s17, 4294966272  ;;  %s20_s29 = sadd.s32 1, %s1062_s29   ;;  %s1340_s11 = sld [smem:[#allocation5_spill]] }
 0x210   : > { %p17_p5 = scmp.ge.s32.totalorder %s20_s29, 4   ;;  %s1341_s24 = smov %s1046_s25 }
 0x211   : > { %s1342_s25 = smov %s1050_s26  ;;  %s1343_s26 = smov %s1162_s14 }
 0x212   : > { %s1344_s27 = smov %s1058_s28  ;;  %19 = sbr.rel (!%p17_p5) target bundleno = 4 (0x4), region = 86 }
 0x215   : > { %s1345_s28 = smov %s1340_s11 }
 0x219   :  { %793 = vsyncpa [#allocation3], 1 }
 0x21a   :  { %795 = vsyncpa [#allocation3 + $0x1], 1 }

</bundles_post_ra>
